<compile_context>
chip_gen: v7x
topology: tpu7x:2x2x1
jax: 0.10.0
libtpu: 0.0.40
codegen_flags: <defaults>
</compile_context>

<pallas_src>
import jax
import jax.numpy as jnp
from jax.experimental import pallas as pl
from jax.experimental.pallas import tpu as pltpu


def _round_up(x, m):
    return ((x + m - 1) // m) * m


def _embed_concat_kernel(ids_ref, tbl_ref, o_ref):
    """ids_ref: (T, 3) int32 -- col 0 = word id, col 1 = pos1 id + Vw,
                                 col 2 = pos2 id + Vw + Vp (disjoint ranges).
    tbl_ref: (2, Vpad, Dtot) bf16 -- plane 0 = hi split, plane 1 = lo split
             of the block-diagonal combined f32 table.
    o_ref:   (T, Dtot) f32 output tile (word | pos1 | pos2 concatenated)."""
    T = o_ref.shape[0]
    Vpad = tbl_ref.shape[1]

    iota = jax.lax.broadcasted_iota(jnp.int32, (T, Vpad), 1)
    wid = ids_ref[:, 0:1]
    p1id = ids_ref[:, 1:2]
    p2id = ids_ref[:, 2:3]

    # Disjoint row ranges => OR of the three one-hots equals their sum, and a
    # single one-hot matmul against the block-diagonal table yields exactly
    # the concatenated row.  Out-of-range ids (padding tokens) -> zero rows.
    hit = (iota == wid) | (iota == p1id) | (iota == p2id)
    # bool -> f32 -> bf16 (bool->f32 is the proven lowering path; the extra
    # convert is one vreg-wide VPU op per tile).
    onehot = hit.astype(jnp.float32).astype(jnp.bfloat16)

    # Two single-pass bf16 MXU matmuls with f32 accumulation (~Precision.HIGH
    # accuracy at 1/3 the MXU passes of HIGHEST).
    acc = jnp.dot(onehot, tbl_ref[0], preferred_element_type=jnp.float32)
    acc = acc + jnp.dot(onehot, tbl_ref[1], preferred_element_type=jnp.float32)
    o_ref[...] = acc.astype(o_ref.dtype)


def build_combined_table(word_table, pos1_table, pos2_table):
    """One-time setup: block-diagonal combined table, split into bf16 hi/lo.

    Row layout:  [0, Vw)          -> word rows, cols [0, Dw)
                 [Vw, Vw+Vp)      -> pos1 rows, cols [Dw, Dw+Dp)
                 [Vw+Vp, Vw+2Vp)  -> pos2 rows, cols [Dw+Dp, Dtot)
    Returns (packed_table[2, Vpad, Dtot] bf16, (Vw, Vp, Dw, Dp))."""
    Vw, Dw = word_table.shape
    Vp, Dp = pos1_table.shape
    assert pos2_table.shape == (Vp, Dp)
    Dtot = Dw + 2 * Dp
    Vtot = Vw + 2 * Vp
    Vpad = _round_up(Vtot, 128)           # pad contraction dim to full lanes

    tbl = jnp.zeros((Vpad, Dtot), jnp.float32)
    tbl = tbl.at[:Vw, :Dw].set(word_table.astype(jnp.float32))
    tbl = tbl.at[Vw:Vw + Vp, Dw:Dw + Dp].set(pos1_table.astype(jnp.float32))
    tbl = tbl.at[Vw + Vp:Vtot, Dw + Dp:].set(pos2_table.astype(jnp.float32))

    hi = tbl.astype(jnp.bfloat16)
    lo = (tbl - hi.astype(jnp.float32)).astype(jnp.bfloat16)
    packed = jnp.stack([hi, lo], axis=0)   # (2, Vpad, Dtot) bf16
    return packed, (Vw, Vp, Dw, Dp)


def embedding_forward(word, pos1, pos2, packed_table, dims, *, tile_tokens=512):
    """word/pos1/pos2: int32 [B, L]; packed_table/dims from build_combined_table.

    Returns f32 [B, L, Dw + 2*Dp] (PyTorch dim=2 concat convention)."""
    Vw, Vp, Dw, Dp = dims
    Dtot = Dw + 2 * Dp
    Vpad = _round_up(Vw + 2 * Vp, 128)
    # The one-hot trick requires the offset id ranges to stay disjoint and
    # consistent with the packed table.
    assert packed_table.shape == (2, Vpad, Dtot), (
        "packed table inconsistent with (Vw, Vp, Dw, Dp) offsets")

    B, L = word.shape
    N = B * L

    # ---- token tiling: large tiles, but >= 2 grid steps for v7x dual-TC ----
    T = min(tile_tokens, _round_up(N, 8))
    if N > 8 and _round_up(N, T) // T < 2:
        T = _round_up((N + 1) // 2, 8)
    Npad = _round_up(N, T)
    n_tiles = Npad // T

    # ---- pack the three id streams into one (Npad, 3) int32 array ----
    ids = jnp.stack(
        [word.reshape(N).astype(jnp.int32),
         pos1.reshape(N).astype(jnp.int32) + Vw,
         pos2.reshape(N).astype(jnp.int32) + Vw + Vp], axis=1)
    # Padding tokens get id == Vpad (never matches the iota) -> zero rows,
    # sliced off below.
    ids = jnp.pad(ids, ((0, Npad - N), (0, 0)), constant_values=Vpad)

    ids_spec = pl.BlockSpec((T, 3), lambda i: (i, 0))
    out_spec = pl.BlockSpec((T, Dtot), lambda i: (i, 0))
    out_shape = jax.ShapeDtypeStruct((Npad, Dtot), jnp.float32)

    # Explicit scoped-VMEM budget: table (single- or double-buffered) +
    # double-buffered id/out tiles, with generous margin.  Prefer raising
    # this over shrinking T if the config grows.
    table_bytes = packed_table.size * packed_table.dtype.itemsize
    tile_bytes = T * 3 * 4 + T * Dtot * 4
    vmem_limit = int(min(max(2 * table_bytes + 4 * tile_bytes + (8 << 20),
                             16 << 20), 48 << 20))

    def _launch(single_buffer_table):
        if single_buffer_table:
            # Constant index_map => keep the table resident with a single
            # buffer (default double-buffering would 2x its VMEM footprint).
            tbl_spec = pl.BlockSpec((2, Vpad, Dtot), lambda i: (0, 0, 0),
                                    pipeline_mode=pl.Buffered(1))
        else:
            tbl_spec = pl.BlockSpec((2, Vpad, Dtot), lambda i: (0, 0, 0))
        return pl.pallas_call(
            _embed_concat_kernel,
            out_shape=out_shape,
            grid=(n_tiles,),
            in_specs=[ids_spec, tbl_spec],
            out_specs=out_spec,
            compiler_params=pltpu.CompilerParams(
                dimension_semantics=("parallel",),
                vmem_limit_bytes=vmem_limit),
        )(ids, packed_table)

    try:
        out = _launch(True)
    except Exception:
        # pipeline_mode=pl.Buffered(1) not supported by this jax build; fall
        # back to the default (double-buffered) resident table.
        out = _launch(False)

    return out[:N].reshape(B, L, Dtot)


def make_params(key, vocab_size, word_dim, pos_num, pos_size):
    """Deterministic parameter init mirroring the module's __init__."""
    k_word, k_p1, k_p2 = jax.random.split(key, 3)
    # data_word_vec stand-in (the module copies a pretrained matrix; synthetic)
    word_table = jax.random.normal(k_word, (vocab_size, word_dim), jnp.float32)
    # xavier_uniform for the pos embeddings, padding_idx=0 row zeroed
    bound = (6.0 / (pos_num + pos_size)) ** 0.5
    pos1_table = jax.random.uniform(k_p1, (pos_num, pos_size), jnp.float32,
                                    minval=-bound, maxval=bound)
    pos2_table = jax.random.uniform(k_p2, (pos_num, pos_size), jnp.float32,
                                    minval=-bound, maxval=bound)
    pos1_table = pos1_table.at[0].set(0.0)
    pos2_table = pos2_table.at[0].set(0.0)
    return word_table, pos1_table, pos2_table


if __name__ == "__main__":
    # Small config consistent with the module: vocab=32, word_dim=16,
    # pos_num=20, pos_size=8; batch=2, seq_len=8 -> output [2, 8, 32].
    VOCAB, DWORD = 32, 16
    POS_NUM, DPOS = 20, 8
    B, L = 2, 8

    key = jax.random.PRNGKey(0)
    kp, kw, k1, k2 = jax.random.split(key, 4)
    word_table, pos1_table, pos2_table = make_params(kp, VOCAB, DWORD,
                                                     POS_NUM, DPOS)
    # One-time table packing (outside the forward path).
    packed_table, dims = build_combined_table(word_table, pos1_table,
                                              pos2_table)
    packed_table = jax.block_until_ready(packed_table)

    word = jax.random.randint(kw, (B, L), 0, VOCAB, jnp.int32)
    pos1 = jax.random.randint(k1, (B, L), 0, POS_NUM, jnp.int32)
    pos2 = jax.random.randint(k2, (B, L), 0, POS_NUM, jnp.int32)
    # include padding_idx hits
    pos1 = pos1.at[0, 0].set(0)
    pos2 = pos2.at[1, 1].set(0)

    out = embedding_forward(word, pos1, pos2, packed_table, dims)
    out = jax.block_until_ready(out)

    # Reference (plain JAX gathers + concat).  The bf16 hi/lo split carries
    # ~16 mantissa bits (rel. err <~ 2^-16), hence the 5e-5 tolerances.
    ref = jnp.concatenate(
        [jnp.take(word_table, word, axis=0),
         jnp.take(pos1_table, pos1, axis=0),
         jnp.take(pos2_table, pos2, axis=0)], axis=2)
    assert out.shape == (B, L, DWORD + 2 * DPOS)
    assert jnp.allclose(out, ref, atol=5e-5, rtol=5e-5), "mismatch vs reference"

    print("KERNEL_OK")
</pallas_src>

<mosaic_0001>
module attributes {stable_mosaic.version = 11 : i64} {
  func.func @_embed_concat_kernel(%arg0: i32, %arg1: memref<8x3xi32, #tpu.memory_space<vmem>>, %arg2: memref<2x128x32xbf16, #tpu.memory_space<vmem>>, %arg3: memref<8x32xf32, #tpu.memory_space<vmem>>) attributes {dimension_semantics = [#tpu.dimension_semantics<parallel>], iteration_bounds = array<i64: 2>, scalar_prefetch = 0 : i64, scratch_operands = 0 : i64, tpu.core_type = #tpu.core_type<tc>, window_params = [{transform_indices = @transform_0, window_bounds = array<i64: 8, 3>}, {pipeline_mode = #tpu.pipeline_mode<synchronous>, transform_indices = @transform_1, window_bounds = array<i64: 2, 128, 32>}, {transform_indices = @transform_2, window_bounds = array<i64: 8, 32>}]} {
    %0 = tpu.iota {dimensions = array<i32: 1>} : vector<8x128xi32>
    %c0 = arith.constant 0 : index
    %c0_0 = arith.constant 0 : index
    %1 = vector.load %arg1[%c0, %c0_0] : memref<8x3xi32, #tpu.memory_space<vmem>>, vector<8x1xi32>
    %c0_1 = arith.constant 0 : index
    %c1 = arith.constant 1 : index
    %2 = vector.load %arg1[%c0_1, %c1] : memref<8x3xi32, #tpu.memory_space<vmem>>, vector<8x1xi32>
    %c0_2 = arith.constant 0 : index
    %c2 = arith.constant 2 : index
    %3 = vector.load %arg1[%c0_2, %c2] : memref<8x3xi32, #tpu.memory_space<vmem>>, vector<8x1xi32>
    %4 = vector.broadcast %1 : vector<8x1xi32> to vector<8x128xi32>
    %5 = arith.cmpi eq, %0, %4 : vector<8x128xi32>
    %6 = vector.broadcast %2 : vector<8x1xi32> to vector<8x128xi32>
    %7 = arith.cmpi eq, %0, %6 : vector<8x128xi32>
    %8 = arith.ori %5, %7 : vector<8x128xi1>
    %9 = vector.broadcast %3 : vector<8x1xi32> to vector<8x128xi32>
    %10 = arith.cmpi eq, %0, %9 : vector<8x128xi32>
    %11 = arith.ori %8, %10 : vector<8x128xi1>
    %12 = arith.extui %11 : vector<8x128xi1> to vector<8x128xi32>
    %13 = arith.sitofp %12 : vector<8x128xi32> to vector<8x128xf32>
    %14 = arith.truncf %13 : vector<8x128xf32> to vector<8x128xbf16>
    %c0_3 = arith.constant 0 : index
    %c0_4 = arith.constant 0 : index
    %c0_5 = arith.constant 0 : index
    %15 = vector.load %arg2[%c0_3, %c0_4, %c0_5] : memref<2x128x32xbf16, #tpu.memory_space<vmem>>, vector<1x128x32xbf16>
    %16 = vector.shape_cast %15 : vector<1x128x32xbf16> to vector<128x32xbf16>
    %cst = arith.constant dense<0.000000e+00> : vector<8x32xf32>
    %17 = tpu.matmul %14, %16, %cst {dimension_numbers = #tpu.dot_dimension_numbers<[1], [0], [0], [1], [0, 0, 1, 1], [], []>} : vector<8x128xbf16>, vector<128x32xbf16>, vector<8x32xf32> -> vector<8x32xf32>
    %c1_6 = arith.constant 1 : index
    %c0_7 = arith.constant 0 : index
    %c0_8 = arith.constant 0 : index
    %18 = vector.load %arg2[%c1_6, %c0_7, %c0_8] : memref<2x128x32xbf16, #tpu.memory_space<vmem>>, vector<1x128x32xbf16>
    %19 = vector.shape_cast %18 : vector<1x128x32xbf16> to vector<128x32xbf16>
    %cst_9 = arith.constant dense<0.000000e+00> : vector<8x32xf32>
    %20 = tpu.matmul %14, %19, %cst_9 {dimension_numbers = #tpu.dot_dimension_numbers<[1], [0], [0], [1], [0, 0, 1, 1], [], []>} : vector<8x128xbf16>, vector<128x32xbf16>, vector<8x32xf32> -> vector<8x32xf32>
    %21 = arith.addf %17, %20 : vector<8x32xf32>
    %c0_10 = arith.constant 0 : index
    %c0_11 = arith.constant 0 : index
    %22 = vector.load %arg3[%c0_10, %c0_11] : memref<8x32xf32, #tpu.memory_space<vmem>>, vector<8x32xf32>
    tpu.vector_store %arg3[%c0_10, %c0_11], %21 {strides = array<i32>} : memref<8x32xf32, #tpu.memory_space<vmem>>, vector<8x32xf32>,
    return
  }
  func.func @transform_0(%arg0: i32) -> (i32, i32) {
    %c0_i32 = arith.constant 0 : i32
    %c0_i32_0 = arith.constant 0 : i32
    return %arg0, %c0_i32 : i32, i32
  }
  func.func @transform_1(%arg0: i32) -> (i32, i32, i32) {
    %c0_i32 = arith.constant 0 : i32
    %c0_i32_0 = arith.constant 0 : i32
    %c0_i32_1 = arith.constant 0 : i32
    %c0_i32_2 = arith.constant 0 : i32
    return %c0_i32, %c0_i32_0, %c0_i32_1 : i32, i32, i32
  }
  func.func @transform_2(%arg0: i32) -> (i32, i32) {
    %c0_i32 = arith.constant 0 : i32
    %c0_i32_0 = arith.constant 0 : i32
    return %arg0, %c0_i32 : i32, i32
  }
}

module attributes {stable_mosaic.version = 11 : i64} {
  func.func @_embed_concat_kernel(%arg0: i32, %arg1: memref<8x3xi32, #tpu.memory_space<vmem>>, %arg2: memref<2x128x32xbf16, #tpu.memory_space<vmem>>, %arg3: memref<8x32xf32, #tpu.memory_space<vmem>>) attributes {dimension_semantics = [#tpu.dimension_semantics<parallel>], iteration_bounds = array<i64: 2>, scalar_prefetch = 0 : i64, scratch_operands = 0 : i64, tpu.core_type = #tpu.core_type<tc>, window_params = [{transform_indices = @transform_0, window_bounds = array<i64: 8, 3>}, {pipeline_mode = #tpu.pipeline_mode<synchronous>, transform_indices = @transform_1, window_bounds = array<i64: 2, 128, 32>}, {transform_indices = @transform_2, window_bounds = array<i64: 8, 32>}]} {
    %0 = tpu.iota {dimensions = array<i32: 1>} : vector<8x128xi32>
    %c0 = arith.constant 0 : index
    %c0_0 = arith.constant 0 : index
    %1 = vector.load %arg1[%c0, %c0_0] : memref<8x3xi32, #tpu.memory_space<vmem>>, vector<8x1xi32>
    %c0_1 = arith.constant 0 : index
    %c1 = arith.constant 1 : index
    %2 = vector.load %arg1[%c0_1, %c1] : memref<8x3xi32, #tpu.memory_space<vmem>>, vector<8x1xi32>
    %c0_2 = arith.constant 0 : index
    %c2 = arith.constant 2 : index
    %3 = vector.load %arg1[%c0_2, %c2] : memref<8x3xi32, #tpu.memory_space<vmem>>, vector<8x1xi32>
    %4 = vector.broadcast %1 : vector<8x1xi32> to vector<8x128xi32>
    %5 = arith.cmpi eq, %0, %4 : vector<8x128xi32>
    %6 = vector.broadcast %2 : vector<8x1xi32> to vector<8x128xi32>
    %7 = arith.cmpi eq, %0, %6 : vector<8x128xi32>
    %8 = arith.ori %5, %7 : vector<8x128xi1>
    %9 = vector.broadcast %3 : vector<8x1xi32> to vector<8x128xi32>
    %10 = arith.cmpi eq, %0, %9 : vector<8x128xi32>
    %11 = arith.ori %8, %10 : vector<8x128xi1>
    %12 = arith.extui %11 : vector<8x128xi1> to vector<8x128xi32>
    %13 = arith.sitofp %12 : vector<8x128xi32> to vector<8x128xf32>
    %14 = arith.truncf %13 : vector<8x128xf32> to vector<8x128xbf16>
    %c0_3 = arith.constant 0 : index
    %c0_4 = arith.constant 0 : index
    %c0_5 = arith.constant 0 : index
    %15 = vector.load %arg2[%c0_3, %c0_4, %c0_5] : memref<2x128x32xbf16, #tpu.memory_space<vmem>>, vector<1x128x32xbf16>
    %16 = vector.shape_cast %15 : vector<1x128x32xbf16> to vector<128x32xbf16>
    %cst = arith.constant dense<0.000000e+00> : vector<8x32xf32>
    %17 = tpu.matmul %14, %16, %cst {dimension_numbers = #tpu.dot_dimension_numbers<[1], [0], [0], [1], [0, 0, 1, 1], [], []>} : vector<8x128xbf16>, vector<128x32xbf16>, vector<8x32xf32> -> vector<8x32xf32>
    %c1_6 = arith.constant 1 : index
    %c0_7 = arith.constant 0 : index
    %c0_8 = arith.constant 0 : index
    %18 = vector.load %arg2[%c1_6, %c0_7, %c0_8] : memref<2x128x32xbf16, #tpu.memory_space<vmem>>, vector<1x128x32xbf16>
    %19 = vector.shape_cast %18 : vector<1x128x32xbf16> to vector<128x32xbf16>
    %cst_9 = arith.constant dense<0.000000e+00> : vector<8x32xf32>
    %20 = tpu.matmul %14, %19, %cst_9 {dimension_numbers = #tpu.dot_dimension_numbers<[1], [0], [0], [1], [0, 0, 1, 1], [], []>} : vector<8x128xbf16>, vector<128x32xbf16>, vector<8x32xf32> -> vector<8x32xf32>
    %21 = arith.addf %17, %20 : vector<8x32xf32>
    %c0_10 = arith.constant 0 : index
    %c0_11 = arith.constant 0 : index
    %22 = vector.load %arg3[%c0_10, %c0_11] : memref<8x32xf32, #tpu.memory_space<vmem>>, vector<8x32xf32>
    tpu.vector_store %arg3[%c0_10, %c0_11], %21 {strides = array<i32>} : memref<8x32xf32, #tpu.memory_space<vmem>>, vector<8x32xf32>,
    return
  }
  func.func @transform_0(%arg0: i32) -> (i32, i32) {
    %c0_i32 = arith.constant 0 : i32
    %c0_i32_0 = arith.constant 0 : i32
    return %arg0, %c0_i32 : i32, i32
  }
  func.func @transform_1(%arg0: i32) -> (i32, i32, i32) {
    %c0_i32 = arith.constant 0 : i32
    %c0_i32_0 = arith.constant 0 : i32
    %c0_i32_1 = arith.constant 0 : i32
    %c0_i32_2 = arith.constant 0 : i32
    return %c0_i32, %c0_i32_0, %c0_i32_1 : i32, i32, i32
  }
  func.func @transform_2(%arg0: i32) -> (i32, i32) {
    %c0_i32 = arith.constant 0 : i32
    %c0_i32_0 = arith.constant 0 : i32
    return %arg0, %c0_i32 : i32, i32
  }
}

</mosaic_0001>

<bundles_post_ra>
// kernel: tpu_custom_call.1
= control target key start
LH: loop header
LB: loop body
LE: loop exit
PB: predicated region body
PF: predicated region fallthrough
CT: control target
= control target key end

     0   :  { %7 = vsyncpa [#allocation3], 0  ;;  %s849_s0 = inlined_call_operand.vmem [shape: s32[16,3], index: 0, kind: input, shape index: {}]   ;;  %s850_s1 = inlined_call_operand.vmem [shape: bf16[2,128,32], index: 1, kind: input, shape index: {}]   ;;  %s851_s2 = inlined_call_operand.hbm [shape: f32[16,32], index: 2, kind: output, shape index: {}]  }
   0x1   :  { %9 = vsyncpa [#allocation3 + $0x1], 0  ;;  %s701_s9 = smov 0   ;;  %s703_s10 = smov 0  }
   0x2   :  { %s705_s11 = smov 0   ;;  %s707_s12 = smov 0  }
   0x3 LB: > { %s722_s13 = sadd.s32 4294967295, %s677_s12   ;;  %s444_s14 = sadd.s32 4294967294, %s677_s12   ;;  %s677_s12 = sphi %s707_s12, %s857_s12   ;;  %s673_s11 = sphi %s705_s11, %s856_s11   ;;  %s669_s10 = sphi %s703_s10, %s855_s10   ;;  %s665_s9 = sphi %s701_s9, %s854_s9  }
   0x4   : > { %s726_s15 = sadd.s32 1, %s677_s12   ;;  %s69_s16 = sadd.s32 1, %s673_s11 }
   0x5   : > { %s66_s17 = ssub.s32 %s677_s12, %s726_s15  ;;  %p79_p0 = scmp.ne.s32.totalorder %s673_s11, %s669_s10 }
   0x6   : > { %p67_p1 = scmp.eq.s32.totalorder %s66_s17, 0  ;;  %p80_p2 = scmp.eq.s32.totalorder %s722_s13, 1 }
   0x7   : > { %p85_p3 = scmp.ne.s32.totalorder %s669_s10, %s665_s9  ;;  %p86_p4 = scmp.eq.s32.totalorder %s444_s14, 1 }
   0x8   : > { %s737_s18 = scalar_select %p67_p1, %s673_s11, %s69_s16  }
   0x9   : > { %p739_p5 = por %p80_p2, %p79_p0  ;;  %p743_p6 = por %p86_p4, %p85_p3 }
   0xa   : > { %p447_p7 = scmp.ge.s32.totalorder %s677_s12, 1  ;;  %p114_p8 = scmp.lt.s32.totalorder %s677_s12, 3 }
   0xc   : > { %p115_p9 = pnand %p447_p7, %p114_p8 }
   0xd   : > { %p135_p10 = scmp.lt.s32.totalorder (!%p115_p9), %s722_s13, 1  ;;  %v599_v0 = vld [vmem:[%s850_s1 + $0x40] sm:$0xff] (!%p115_p9)   ;;  %v679_v1 = vmov (!%p115_p9), 0   ;;  %v680_v2 = vmov (!%p115_p9), 2   ;;  %v681_v3 = vmov (!%p115_p9), 0.0   ;;  %v601_v5 = vld [vmem:[%s850_s1 + $0x48] sm:$0xff] (!%p115_p9)   ;;  %v140_v21 = vlaneseq (!%p115_p9) }
   0xe   : > { %118 = sbr.rel (%p115_p9) target bundleno = 391 (0x187), region = 28  ;;  %595 = vset.pattern.permute.xlu0 (!%p115_p9), %v679_v1  ;;  %597 = vset.pattern.permute.xlu1 (!%p115_p9), %v680_v2  ;;  %v600_v4 = vld [vmem:[%s850_s1] sm:$0xff] (!%p115_p9)   ;;  %v602_v6 = vld [vmem:[%s850_s1 + $0x8] sm:$0xff] (!%p115_p9)   ;;  %v603_v8 = vld [vmem:[%s850_s1 + $0x50] sm:$0xff] (!%p115_p9)   ;;  %v682_v10 = vmov (!%p115_p9), 1   ;;  %vm683_vm0 = vmmov (!%p115_p9), 0  }
   0xf   : > { %509 = vmatprep.subr.bf16.mxu1 (!%p115_p9), %v681_v3  ;;  %529 = vmatprep.subr.bf16.mxu0 (!%p115_p9), %v681_v3  ;;  %v604_v9 = vld [vmem:[%s850_s1 + $0x10] sm:$0xff] (!%p115_p9)   ;;  %v605_v11 = vld [vmem:[%s850_s1 + $0x58] sm:$0xff] (!%p115_p9)   ;;  %v607_v13 = vld [vmem:[%s850_s1 + $0x60] sm:$0xff] (!%p115_p9)   ;;  %v141_v23 = vand.u32 (!%p115_p9), 127, %v140_v21  ;;  %v684_v26 = vmov (!%p115_p9), 1.0|1.0  }
  0x10   : > { %510 = vmatpush3.bf16.msra.mxu1 (!%p115_p9), %v599_v0  ;;  %530 = vmatpush3.bf16.msra.mxu0 (!%p115_p9), %v600_v4  ;;  %v606_v12 = vld [vmem:[%s850_s1 + $0x18] sm:$0xff] (!%p115_p9)   ;;  %v608_v14 = vld [vmem:[%s850_s1 + $0x20] sm:$0xff] (!%p115_p9)   ;;  %v609_v15 = vld [vmem:[%s850_s1 + $0x68] sm:$0xff] (!%p115_p9)   ;;  %s132_s17 = sand.u32 (!%p115_p9), 1, %s669_s10   ;;  %s488_s22 = sshll.u32 (!%p115_p9), %s722_s13, 7  ;;  %vm369_vm7 = vcmask (!%p115_p9), 261120  }
  0x11   : > { %511 = vmatprep.subr.bf16.mxu1 (!%p115_p9), %v681_v3  ;;  %531 = vmatprep.subr.bf16.mxu0 (!%p115_p9), %v681_v3  ;;  %v610_v16 = vld [vmem:[%s850_s1 + $0x28] sm:$0xff] (!%p115_p9)   ;;  %v611_v17 = vld [vmem:[%s850_s1 + $0x70] sm:$0xff] (!%p115_p9)   ;;  %v613_v19 = vld [vmem:[%s850_s1 + $0x78] sm:$0xff] (!%p115_p9)   ;;  %s448_s21 = sshll.u32 (!%p115_p9), %s132_s17, 3  ;;  %s807_s27 = scalar_lea.hbm (!%p115_p9), %s851_s2, %s488_s22 }
  0x12   : > { %525 = vmatprep.mubr.msk.bf16.mxu1 (!%p115_p9), %vm683_vm0, %v681_v3  ;;  %545 = vmatprep.mubr.msk.bf16.mxu0 (!%p115_p9), %vm683_vm0, %v681_v3  ;;  %v612_v18 = vld [vmem:[%s850_s1 + $0x30] sm:$0xff] (!%p115_p9)   ;;  %v614_v20 = vld [vmem:[%s850_s1 + $0x38] sm:$0xff] (!%p115_p9)   ;;  %s685_s29 = smov (!%p115_p9), [#allocation2]  }
  0x13   : > { %s619_s30 = sshll.u32 (!%p115_p9), %s685_s29, 4  ;;  %s620_s30 = int_to_ptr.vmem [resolvable:$false] %s619_s30 }
  0x14   : > { %512 = vmatpush3.bf16.msra.mxu1 (!%p115_p9), %v601_v5  ;;  %532 = vmatpush3.bf16.msra.mxu0 (!%p115_p9), %v602_v6  ;;  %s621_s3 = scalar_lea.vmem (!%p115_p9), %s620_s30, 256 }
  0x15   : > { %s136_s23 = scalar_select %p135_p10, %s722_s13, 1  ;;  %513 = vmatprep.subr.bf16.mxu1 %v681_v3  ;;  %533 = vmatprep.subr.bf16.mxu0 %v681_v3 }
  0x16   : > { %s372_s13 = scalar_lea.sflag [#allocation3], %s132_s17 }
  0x17   : > { %s449_s28 = sshll.u32 %s136_s23, 3  ;;  %s134_s23 = scalar_lea.vmem [#allocation2], %s448_s21 }
  0x18   : > { %s138_s5 = scalar_lea.vmem %s849_s0, %s449_s28  ;;  %514 = vmatpush3.bf16.msra.mxu1 %v603_v8  ;;  %534 = vmatpush3.bf16.msra.mxu0 %v604_v9  ;;  %s385_s24 = sshll.u32 %s134_s23, 4  ;;  %s809_s24 = int_to_ptr.vmem [resolvable:$true] %s385_s24 }
  0x19   : > { %v142_v7 = vld [vmem:[%s138_s5] sm:$0xff]  ;;  %515 = vmatprep.subr.bf16.mxu1 %v681_v3  ;;  %535 = vmatprep.subr.bf16.mxu0 %v681_v3  ;;  %s615_s28 = scalar_lea.vmem %s809_s24, 128  ;;  %p622_p0 = scmp.lt.s32.totalorder %s809_s24, %s620_s30 }
  0x1a   : > { %144 = vperm.xlu0 %595, %v142_v7   ;;  %153 = vperm.xlu1 %597, %v142_v7   ;;  %p616_p11 = scmp.ne.s32.totalorder %s809_s24, %s615_s28  ;;  %p623_p1 = scmp.lt.s32.totalorder %s621_s3, %s615_s28 }
  0x1c   : > { %516 = vmatpush3.bf16.msra.mxu1 %v605_v11  ;;  %536 = vmatpush3.bf16.msra.mxu0 %v606_v12  ;;  %p617_p12 = pnand %p616_p11, %p739_p5  ;;  %p624_p2 = por %p623_p1, %p622_p0 }
  0x1d   : > { %517 = vmatprep.subr.bf16.mxu1 %v681_v3  ;;  %537 = vmatprep.subr.bf16.mxu0 %v681_v3 }
  0x1e   : > { %596 = vset.pattern.permute.xlu0 %v682_v10  ;;  %p618_p13 = pneg %p617_p12 }
  0x1f   : > { %148 = vperm.xlu0 %596, %v142_v7  }
  0x20   : > { %518 = vmatpush3.bf16.msra.mxu1 %v607_v13  ;;  %538 = vmatpush3.bf16.msra.mxu0 %v608_v14  ;;  %p625_p3 = pnand %p624_p2, %p618_p13 }
  0x21   : > { %519 = vmatprep.subr.bf16.mxu1 %v681_v3  ;;  %539 = vmatprep.subr.bf16.mxu0 %v681_v3 }
  0x23   : > { %598 = vset.pattern.permute.xlu0 %v680_v2 }
  0x24   : > { %520 = vmatpush3.bf16.msra.mxu1 %v609_v15  ;;  %540 = vmatpush3.bf16.msra.mxu0 %v610_v16 }
  0x25   : > { %521 = vmatprep.subr.bf16.mxu1 %v681_v3  ;;  %541 = vmatprep.subr.bf16.mxu0 %v681_v3 }
  0x28   : > { %522 = vmatpush3.bf16.msra.mxu1 %v611_v17  ;;  %542 = vmatpush3.bf16.msra.mxu0 %v612_v18 }
  0x29   : > { %523 = vmatprep.subr.bf16.mxu1 %v681_v3  ;;  %543 = vmatprep.subr.bf16.mxu0 %v681_v3 }
  0x2c   : > { %524 = vmatpush3.bf16.msra.mxu1 %v613_v19  ;;  %544 = vmatpush3.bf16.msra.mxu0 %v614_v20 }
  0x99   : > { %v145_v22 = vpop.permute.xlu0 %144  ;;  %v154_v24 = vpop.permute.xlu1 %153 }
  0x9a   : > { %vm155_vm1 = vcmp.eq.s32.totalorder %v141_v23, %v154_v24  ;;  %vm146_vm2 = vcmp.eq.s32.totalorder %v141_v23, %v145_v22 }
  0x9e   : > { %v149_v25 = vpop.permute.xlu0 %148 }
  0x9f   : > { %vm150_vm3 = vcmp.eq.s32.totalorder %v141_v23, %v149_v25 }
  0xa0   : > { %vm151_vm4 = vmor %vm146_vm2, %vm150_vm3 }
  0xa1   : > { %vm156_vm5 = vmor %vm151_vm4, %vm155_vm1 }
  0xa2   : > { %vm475_vm6 = vmpackc.low %vm156_vm5, %vm156_vm5 }
  0xa3   : > { %526 = vmatmul.mubr.msk.bf16.vlgmr.msra.gmra.mrb[0].mxu1 %vm475_vm6, %v684_v26  ;;  %546 = vmatmul.mubr.msk.bf16.vlgmr.msra.gmra.mrb[0].mxu0 %vm475_vm6, %v684_v26 }
 0x176   : > { %v275_v27 = vpop.f32.mrb[0].mxu1  ;;  %v363_v28 = vpop.f32.mrb[0].mxu0 }
 0x177   : > { %v364_v29 = vadd.f32 %v363_v28, %v275_v27  ;;  %v527_v30 = vpop.f32.mrb[1].mxu1  ;;  %v547_v31 = vpop.f32.mrb[1].mxu0 }
 0x178   : > { %v278_v32 = vpop.f32.mrb[2].mxu1  ;;  %v366_v33 = vpop.f32.mrb[2].mxu0 }
 0x179   : > { %v528_v34 = vpop.f32.mrb[3].mxu1  ;;  %v548_v35 = vpop.f32.mrb[3].mxu0  ;;  %370 = vst.msk [vmem:[%s134_s23] sm:$0xff] %vm369_vm7, %v364_v29 }
 0x17a   : > { %628 = shalt.err (!%p625_p3)
}
 0x17b   : > { %s629_s4 = scalar_lea.hbm %s807_s27, 128  ;;  %s633_s7 = scalar_lea.hbm %s851_s2, 256 }
 0x17c   : > { %p630_p4 = scmp.ne.s32.totalorder %s807_s27, %s629_s4  ;;  %p634_p9 = scmp.lt.u32.totalorder %s807_s27, %s851_s2 }
 0x17d   : > { %p635_p10 = scmp.lt.u32.totalorder %s633_s7, %s629_s4  ;;  %p637_p12 = scmp.lt.u32.totalorder %s629_s4, %s807_s27 }
 0x17e   : > { %p631_p7 = pnand %p630_p4, %p739_p5 }
 0x17f   : > { %p636_p11 = por %p635_p10, %p634_p9 }
 0x180   : > { %p632_p8 = pneg %p631_p7 }
 0x181   : > { %p638_p13 = por %p637_p12, %p636_p11 }
 0x183   : > { %p639_p0 = pnand %p638_p13, %p632_p8 }
 0x185   : > { %642 = shalt.err (!%p639_p0)
}
 0x186   : > { %550 = dma.vmem_to_hbm [thread:$0]  (%p739_p5), %s809_s24, 128, %s807_s27, %s372_s13  }
 0x187 PF: > { %p556_p1 = scmp.ge.s32.totalorder %s677_s12, 2  ;;  %s397_s16 = sand.u32 1, %s665_s9  }
 0x188   : > { %s398_s17 = scalar_lea.sflag [#allocation3], %s397_s16 }
 0x189   : > { %p553_p2 = pnand %p556_p1, %p743_p6 }
 0x18b   : > { %660 = dma.done.wait (!%p553_p2), %s398_s17, 128  }
 0x18c   : > { %662 = vsyncadd (!%p553_p2), %s398_s17, 4294967168  ;;  %p12_p3 = scmp.ge.s32.totalorder %s726_s15, 4   ;;  %s854_s9 = smov %s669_s10 }
 0x18d   : > { %s855_s10 = smov %s673_s11  ;;  %s856_s11 = smov %s737_s18 }
 0x18e   : > { %s857_s12 = smov %s726_s15  ;;  %14 = sbr.rel (!%p12_p3) target bundleno = 3 (0x3), region = 64 }
 0x195   :  { %403 = vsyncpa [#allocation3], 1 }
 0x196   :  { %405 = vsyncpa [#allocation3 + $0x1], 1 }

// kernel: tpu_custom_call.1
= control target key start
LH: loop header
LB: loop body
LE: loop exit
PB: predicated region body
PF: predicated region fallthrough
CT: control target
= control target key end

     0   :  { %7 = vsyncpa [#allocation3], 0  ;;  %s849_s0 = inlined_call_operand.vmem [shape: s32[16,3], index: 0, kind: input, shape index: {}]   ;;  %s850_s1 = inlined_call_operand.vmem [shape: bf16[2,128,32], index: 1, kind: input, shape index: {}]   ;;  %s851_s2 = inlined_call_operand.hbm [shape: f32[16,32], index: 2, kind: output, shape index: {}]  }
   0x1   :  { %9 = vsyncpa [#allocation3 + $0x1], 0  ;;  %s701_s9 = smov 0   ;;  %s703_s10 = smov 0  }
   0x2   :  { %s705_s11 = smov 0   ;;  %s707_s12 = smov 0  }
   0x3 LB: > { %s722_s13 = sadd.s32 4294967295, %s677_s12   ;;  %s444_s14 = sadd.s32 4294967294, %s677_s12   ;;  %s677_s12 = sphi %s707_s12, %s857_s12   ;;  %s673_s11 = sphi %s705_s11, %s856_s11   ;;  %s669_s10 = sphi %s703_s10, %s855_s10   ;;  %s665_s9 = sphi %s701_s9, %s854_s9  }
   0x4   : > { %s726_s15 = sadd.s32 1, %s677_s12   ;;  %s69_s16 = sadd.s32 1, %s673_s11 }
   0x5   : > { %s66_s17 = ssub.s32 %s677_s12, %s726_s15  ;;  %p79_p0 = scmp.ne.s32.totalorder %s673_s11, %s669_s10 }
   0x6   : > { %p67_p1 = scmp.eq.s32.totalorder %s66_s17, 0  ;;  %p80_p2 = scmp.eq.s32.totalorder %s722_s13, 1 }
   0x7   : > { %p85_p3 = scmp.ne.s32.totalorder %s669_s10, %s665_s9  ;;  %p86_p4 = scmp.eq.s32.totalorder %s444_s14, 1 }
   0x8   : > { %s737_s18 = scalar_select %p67_p1, %s673_s11, %s69_s16  }
   0x9   : > { %p739_p5 = por %p80_p2, %p79_p0  ;;  %p743_p6 = por %p86_p4, %p85_p3 }
   0xa   : > { %p447_p7 = scmp.ge.s32.totalorder %s677_s12, 1  ;;  %p114_p8 = scmp.lt.s32.totalorder %s677_s12, 3 }
   0xc   : > { %p115_p9 = pnand %p447_p7, %p114_p8 }
   0xd   : > { %p135_p10 = scmp.lt.s32.totalorder (!%p115_p9), %s722_s13, 1  ;;  %v599_v0 = vld [vmem:[%s850_s1 + $0x40] sm:$0xff] (!%p115_p9)   ;;  %v679_v1 = vmov (!%p115_p9), 0   ;;  %v680_v2 = vmov (!%p115_p9), 2   ;;  %v681_v3 = vmov (!%p115_p9), 0.0   ;;  %v601_v5 = vld [vmem:[%s850_s1 + $0x48] sm:$0xff] (!%p115_p9)   ;;  %v140_v21 = vlaneseq (!%p115_p9) }
   0xe   : > { %118 = sbr.rel (%p115_p9) target bundleno = 391 (0x187), region = 28  ;;  %595 = vset.pattern.permute.xlu0 (!%p115_p9), %v679_v1  ;;  %597 = vset.pattern.permute.xlu1 (!%p115_p9), %v680_v2  ;;  %v600_v4 = vld [vmem:[%s850_s1] sm:$0xff] (!%p115_p9)   ;;  %v602_v6 = vld [vmem:[%s850_s1 + $0x8] sm:$0xff] (!%p115_p9)   ;;  %v603_v8 = vld [vmem:[%s850_s1 + $0x50] sm:$0xff] (!%p115_p9)   ;;  %v682_v10 = vmov (!%p115_p9), 1   ;;  %vm683_vm0 = vmmov (!%p115_p9), 0  }
   0xf   : > { %509 = vmatprep.subr.bf16.mxu1 (!%p115_p9), %v681_v3  ;;  %529 = vmatprep.subr.bf16.mxu0 (!%p115_p9), %v681_v3  ;;  %v604_v9 = vld [vmem:[%s850_s1 + $0x10] sm:$0xff] (!%p115_p9)   ;;  %v605_v11 = vld [vmem:[%s850_s1 + $0x58] sm:$0xff] (!%p115_p9)   ;;  %v607_v13 = vld [vmem:[%s850_s1 + $0x60] sm:$0xff] (!%p115_p9)   ;;  %v141_v23 = vand.u32 (!%p115_p9), 127, %v140_v21  ;;  %v684_v26 = vmov (!%p115_p9), 1.0|1.0  }
  0x10   : > { %510 = vmatpush3.bf16.msra.mxu1 (!%p115_p9), %v599_v0  ;;  %530 = vmatpush3.bf16.msra.mxu0 (!%p115_p9), %v600_v4  ;;  %v606_v12 = vld [vmem:[%s850_s1 + $0x18] sm:$0xff] (!%p115_p9)   ;;  %v608_v14 = vld [vmem:[%s850_s1 + $0x20] sm:$0xff] (!%p115_p9)   ;;  %v609_v15 = vld [vmem:[%s850_s1 + $0x68] sm:$0xff] (!%p115_p9)   ;;  %s132_s17 = sand.u32 (!%p115_p9), 1, %s669_s10   ;;  %s488_s22 = sshll.u32 (!%p115_p9), %s722_s13, 7  ;;  %vm369_vm7 = vcmask (!%p115_p9), 261120  }
  0x11   : > { %511 = vmatprep.subr.bf16.mxu1 (!%p115_p9), %v681_v3  ;;  %531 = vmatprep.subr.bf16.mxu0 (!%p115_p9), %v681_v3  ;;  %v610_v16 = vld [vmem:[%s850_s1 + $0x28] sm:$0xff] (!%p115_p9)   ;;  %v611_v17 = vld [vmem:[%s850_s1 + $0x70] sm:$0xff] (!%p115_p9)   ;;  %v613_v19 = vld [vmem:[%s850_s1 + $0x78] sm:$0xff] (!%p115_p9)   ;;  %s448_s21 = sshll.u32 (!%p115_p9), %s132_s17, 3  ;;  %s807_s27 = scalar_lea.hbm (!%p115_p9), %s851_s2, %s488_s22 }
  0x12   : > { %525 = vmatprep.mubr.msk.bf16.mxu1 (!%p115_p9), %vm683_vm0, %v681_v3  ;;  %545 = vmatprep.mubr.msk.bf16.mxu0 (!%p115_p9), %vm683_vm0, %v681_v3  ;;  %v612_v18 = vld [vmem:[%s850_s1 + $0x30] sm:$0xff] (!%p115_p9)   ;;  %v614_v20 = vld [vmem:[%s850_s1 + $0x38] sm:$0xff] (!%p115_p9)   ;;  %s685_s29 = smov (!%p115_p9), [#allocation2]  }
  0x13   : > { %s619_s30 = sshll.u32 (!%p115_p9), %s685_s29, 4  ;;  %s620_s30 = int_to_ptr.vmem [resolvable:$false] %s619_s30 }
  0x14   : > { %512 = vmatpush3.bf16.msra.mxu1 (!%p115_p9), %v601_v5  ;;  %532 = vmatpush3.bf16.msra.mxu0 (!%p115_p9), %v602_v6  ;;  %s621_s3 = scalar_lea.vmem (!%p115_p9), %s620_s30, 256 }
  0x15   : > { %s136_s23 = scalar_select %p135_p10, %s722_s13, 1  ;;  %513 = vmatprep.subr.bf16.mxu1 %v681_v3  ;;  %533 = vmatprep.subr.bf16.mxu0 %v681_v3 }
  0x16   : > { %s372_s13 = scalar_lea.sflag [#allocation3], %s132_s17 }
  0x17   : > { %s449_s28 = sshll.u32 %s136_s23, 3  ;;  %s134_s23 = scalar_lea.vmem [#allocation2], %s448_s21 }
  0x18   : > { %s138_s5 = scalar_lea.vmem %s849_s0, %s449_s28  ;;  %514 = vmatpush3.bf16.msra.mxu1 %v603_v8  ;;  %534 = vmatpush3.bf16.msra.mxu0 %v604_v9  ;;  %s385_s24 = sshll.u32 %s134_s23, 4  ;;  %s809_s24 = int_to_ptr.vmem [resolvable:$true] %s385_s24 }
  0x19   : > { %v142_v7 = vld [vmem:[%s138_s5] sm:$0xff]  ;;  %515 = vmatprep.subr.bf16.mxu1 %v681_v3  ;;  %535 = vmatprep.subr.bf16.mxu0 %v681_v3  ;;  %s615_s28 = scalar_lea.vmem %s809_s24, 128  ;;  %p622_p0 = scmp.lt.s32.totalorder %s809_s24, %s620_s30 }
  0x1a   : > { %144 = vperm.xlu0 %595, %v142_v7   ;;  %153 = vperm.xlu1 %597, %v142_v7   ;;  %p616_p11 = scmp.ne.s32.totalorder %s809_s24, %s615_s28  ;;  %p623_p1 = scmp.lt.s32.totalorder %s621_s3, %s615_s28 }
  0x1c   : > { %516 = vmatpush3.bf16.msra.mxu1 %v605_v11  ;;  %536 = vmatpush3.bf16.msra.mxu0 %v606_v12  ;;  %p617_p12 = pnand %p616_p11, %p739_p5  ;;  %p624_p2 = por %p623_p1, %p622_p0 }
  0x1d   : > { %517 = vmatprep.subr.bf16.mxu1 %v681_v3  ;;  %537 = vmatprep.subr.bf16.mxu0 %v681_v3 }
  0x1e   : > { %596 = vset.pattern.permute.xlu0 %v682_v10  ;;  %p618_p13 = pneg %p617_p12 }
  0x1f   : > { %148 = vperm.xlu0 %596, %v142_v7  }
  0x20   : > { %518 = vmatpush3.bf16.msra.mxu1 %v607_v13  ;;  %538 = vmatpush3.bf16.msra.mxu0 %v608_v14  ;;  %p625_p3 = pnand %p624_p2, %p618_p13 }
  0x21   : > { %519 = vmatprep.subr.bf16.mxu1 %v681_v3  ;;  %539 = vmatprep.subr.bf16.mxu0 %v681_v3 }
  0x23   : > { %598 = vset.pattern.permute.xlu0 %v680_v2 }
  0x24   : > { %520 = vmatpush3.bf16.msra.mxu1 %v609_v15  ;;  %540 = vmatpush3.bf16.msra.mxu0 %v610_v16 }
  0x25   : > { %521 = vmatprep.subr.bf16.mxu1 %v681_v3  ;;  %541 = vmatprep.subr.bf16.mxu0 %v681_v3 }
  0x28   : > { %522 = vmatpush3.bf16.msra.mxu1 %v611_v17  ;;  %542 = vmatpush3.bf16.msra.mxu0 %v612_v18 }
  0x29   : > { %523 = vmatprep.subr.bf16.mxu1 %v681_v3  ;;  %543 = vmatprep.subr.bf16.mxu0 %v681_v3 }
  0x2c   : > { %524 = vmatpush3.bf16.msra.mxu1 %v613_v19  ;;  %544 = vmatpush3.bf16.msra.mxu0 %v614_v20 }
  0x99   : > { %v145_v22 = vpop.permute.xlu0 %144  ;;  %v154_v24 = vpop.permute.xlu1 %153 }
  0x9a   : > { %vm155_vm1 = vcmp.eq.s32.totalorder %v141_v23, %v154_v24  ;;  %vm146_vm2 = vcmp.eq.s32.totalorder %v141_v23, %v145_v22 }
  0x9e   : > { %v149_v25 = vpop.permute.xlu0 %148 }
  0x9f   : > { %vm150_vm3 = vcmp.eq.s32.totalorder %v141_v23, %v149_v25 }
  0xa0   : > { %vm151_vm4 = vmor %vm146_vm2, %vm150_vm3 }
  0xa1   : > { %vm156_vm5 = vmor %vm151_vm4, %vm155_vm1 }
  0xa2   : > { %vm475_vm6 = vmpackc.low %vm156_vm5, %vm156_vm5 }
  0xa3   : > { %526 = vmatmul.mubr.msk.bf16.vlgmr.msra.gmra.mrb[0].mxu1 %vm475_vm6, %v684_v26  ;;  %546 = vmatmul.mubr.msk.bf16.vlgmr.msra.gmra.mrb[0].mxu0 %vm475_vm6, %v684_v26 }
 0x176   : > { %v275_v27 = vpop.f32.mrb[0].mxu1  ;;  %v363_v28 = vpop.f32.mrb[0].mxu0 }
 0x177   : > { %v364_v29 = vadd.f32 %v363_v28, %v275_v27  ;;  %v527_v30 = vpop.f32.mrb[1].mxu1  ;;  %v547_v31 = vpop.f32.mrb[1].mxu0 }
 0x178   : > { %v278_v32 = vpop.f32.mrb[2].mxu1  ;;  %v366_v33 = vpop.f32.mrb[2].mxu0 }
 0x179   : > { %v528_v34 = vpop.f32.mrb[3].mxu1  ;;  %v548_v35 = vpop.f32.mrb[3].mxu0  ;;  %370 = vst.msk [vmem:[%s134_s23] sm:$0xff] %vm369_vm7, %v364_v29 }
 0x17a   : > { %628 = shalt.err (!%p625_p3)
}
 0x17b   : > { %s629_s4 = scalar_lea.hbm %s807_s27, 128  ;;  %s633_s7 = scalar_lea.hbm %s851_s2, 256 }
 0x17c   : > { %p630_p4 = scmp.ne.s32.totalorder %s807_s27, %s629_s4  ;;  %p634_p9 = scmp.lt.u32.totalorder %s807_s27, %s851_s2 }
 0x17d   : > { %p635_p10 = scmp.lt.u32.totalorder %s633_s7, %s629_s4  ;;  %p637_p12 = scmp.lt.u32.totalorder %s629_s4, %s807_s27 }
 0x17e   : > { %p631_p7 = pnand %p630_p4, %p739_p5 }
 0x17f   : > { %p636_p11 = por %p635_p10, %p634_p9 }
 0x180   : > { %p632_p8 = pneg %p631_p7 }
 0x181   : > { %p638_p13 = por %p637_p12, %p636_p11 }
 0x183   : > { %p639_p0 = pnand %p638_p13, %p632_p8 }
 0x185   : > { %642 = shalt.err (!%p639_p0)
}
 0x186   : > { %550 = dma.vmem_to_hbm [thread:$0]  (%p739_p5), %s809_s24, 128, %s807_s27, %s372_s13  }
 0x187 PF: > { %p556_p1 = scmp.ge.s32.totalorder %s677_s12, 2  ;;  %s397_s16 = sand.u32 1, %s665_s9  }
 0x188   : > { %s398_s17 = scalar_lea.sflag [#allocation3], %s397_s16 }
 0x189   : > { %p553_p2 = pnand %p556_p1, %p743_p6 }
 0x18b   : > { %660 = dma.done.wait (!%p553_p2), %s398_s17, 128  }
 0x18c   : > { %662 = vsyncadd (!%p553_p2), %s398_s17, 4294967168  ;;  %p12_p3 = scmp.ge.s32.totalorder %s726_s15, 4   ;;  %s854_s9 = smov %s669_s10 }
 0x18d   : > { %s855_s10 = smov %s673_s11  ;;  %s856_s11 = smov %s737_s18 }
 0x18e   : > { %s857_s12 = smov %s726_s15  ;;  %14 = sbr.rel (!%p12_p3) target bundleno = 3 (0x3), region = 64 }
 0x195   :  { %403 = vsyncpa [#allocation3], 1 }
 0x196   :  { %405 = vsyncpa [#allocation3 + $0x1], 1 }

</bundles_post_ra>
